<compile_context>
chip_gen: v5e
topology: v5e:2x2
jax: 0.10.0
libtpu: 0.0.40
codegen_flags: <defaults>
</compile_context>

<pallas_src>
import functools

import jax
import jax.numpy as jnp
from jax.experimental import pallas as pl
from jax.experimental.pallas import tpu as pltpu


def _imunet_kernel(wt_ref, b_ref, x_ref, o_ref):
    """One grid step: o[:, tile] = W^T @ x[:, tile] + B, via VPU FMAs only.

    wt_ref : SMEM (imu_out*imu_in,) f32, row-major (j, k) -> W^T[j, k]
    b_ref  : SMEM (imu_out,) f32 folded bias
    x_ref  : VMEM (imu_in, TILE_N) f32, N on lanes
    o_ref  : VMEM (imu_out, TILE_N) f32, N on lanes (lane-dense store)
    """
    imu_in = x_ref.shape[0]
    imu_out = o_ref.shape[0]
    x = x_ref[...]
    rows = []
    for j in range(imu_out):  # fully unrolled: imu_out * imu_in scalar-vector FMAs
        acc = x[0:1, :] * wt_ref[j * imu_in]
        for k in range(1, imu_in):
            acc = acc + x[k:k + 1, :] * wt_ref[j * imu_in + k]
        rows.append(acc + b_ref[j])
    o_ref[...] = jnp.concatenate(rows, axis=0).astype(o_ref.dtype)


def _round_up(v, m):
    return ((v + m - 1) // m) * m


@functools.partial(jax.jit, static_argnames=("max_tile_n",))
def imunet_forward(x, w1, b1, w2, b2, *, max_tile_n=2048):
    """x: (batch, seq, imu_in) f32 -> (batch, seq, imu_out) f32.

    Weights use the (in_features, out_features) layout, i.e. the transpose of
    PyTorch's nn.Linear storage, so y = x @ W + b matches y = x @ W_pt.T + b.
    """
    batch, seq, imu_in = x.shape
    imu_out = w2.shape[1]
    n = batch * seq

    # --- fold the two Linears (Dropout p=0 is the identity) ------------------
    w = jnp.dot(w1, w2, preferred_element_type=jnp.float32)        # (imu_in, imu_out)
    b = jnp.dot(b1, w2, preferred_element_type=jnp.float32) + b2   # (imu_out,)
    wt_flat = w.T.reshape(imu_out * imu_in)                        # row-major (j, k)

    # --- transposed, lane-dense presentation: N on lanes ---------------------
    tile_n = min(max_tile_n, _round_up(n, 128))
    n_pad = _round_up(n, tile_n)
    xt = x.reshape(n, imu_in).T                                    # (imu_in, n)
    if n_pad != n:
        xt = jnp.pad(xt, ((0, 0), (0, n_pad - n)))

    out_t = pl.pallas_call(
        _imunet_kernel,
        out_shape=jax.ShapeDtypeStruct((imu_out, n_pad), x.dtype),
        grid=(n_pad // tile_n,),
        in_specs=[
            pl.BlockSpec(memory_space=pltpu.MemorySpace.SMEM),     # folded W^T
            pl.BlockSpec(memory_space=pltpu.MemorySpace.SMEM),     # folded bias
            pl.BlockSpec((imu_in, tile_n), lambda i: (0, i)),
        ],
        out_specs=pl.BlockSpec((imu_out, tile_n), lambda i: (0, i)),
        compiler_params=pltpu.CompilerParams(
            dimension_semantics=("parallel",),
            vmem_limit_bytes=32 * 1024 * 1024,
        ),
    )(wt_flat, b, xt)

    # layout plumbing back to the module-facing (batch, seq, imu_out) shape
    return out_t[:, :n].T.reshape(batch, seq, imu_out)


def init_params(key, imu_in=6, hidden_units=12, imu_out=3):
    """Deterministic synthetic parameters matching nn.Linear shapes.

    PyTorch stores Linear weights as (out, in); we keep the transposed
    (in, out) layout so the math is x @ W directly.
    """
    k1, k2, k3, k4 = jax.random.split(key, 4)
    w1 = jax.random.normal(k1, (imu_in, hidden_units), jnp.float32) * 0.1
    b1 = jax.random.normal(k2, (hidden_units,), jnp.float32) * 0.1
    w2 = jax.random.normal(k3, (hidden_units, imu_out), jnp.float32) * 0.1
    b2 = jax.random.normal(k4, (imu_out,), jnp.float32) * 0.1
    return w1, b1, w2, b2


def _reference(x, w1, b1, w2, b2):
    n = x.shape[0] * x.shape[1]
    imu_in = x.shape[2]
    y = (x.reshape(n, imu_in) @ w1 + b1) @ w2 + b2
    return y.reshape(x.shape[0], x.shape[1], -1)


if __name__ == "__main__":
    key = jax.random.PRNGKey(0)
    kx, kp, kx2 = jax.random.split(key, 3)

    batch, seq, imu_in, hidden, imu_out = 2, 8, 6, 12, 3
    w1, b1, w2, b2 = init_params(kp, imu_in, hidden, imu_out)

    # Small case (single grid step, padded 16 -> 128 lanes).
    x = jax.random.normal(kx, (batch, seq, imu_in), jnp.float32)
    out = imunet_forward(x, w1, b1, w2, b2)
    jax.block_until_ready(out)
    ref = _reference(x, w1, b1, w2, b2)
    assert out.shape == (batch, seq, imu_out)
    assert jnp.allclose(out, ref, atol=1e-5, rtol=1e-5)

    # Slightly larger case with a small tile cap to exercise the multi-block
    # grid path + column padding (n = 300 -> 3 tiles of 128 lanes).
    x2 = jax.random.normal(kx2, (3, 100, imu_in), jnp.float32)
    out2 = imunet_forward(x2, w1, b1, w2, b2, max_tile_n=128)
    jax.block_until_ready(out2)
    ref2 = _reference(x2, w1, b1, w2, b2)
    assert out2.shape == (3, 100, imu_out)
    assert jnp.allclose(out2, ref2, atol=1e-5, rtol=1e-5)

    print("KERNEL_OK")
</pallas_src>

<mosaic_0001>
module attributes {stable_mosaic.version = 11 : i64} {
  func.func @_imunet_kernel(%arg0: i32, %arg1: memref<18xf32, #tpu.memory_space<smem>>, %arg2: memref<3xf32, #tpu.memory_space<smem>>, %arg3: memref<6x128xf32, #tpu.memory_space<vmem>>, %arg4: memref<3x128xf32, #tpu.memory_space<vmem>>) attributes {dimension_semantics = [#tpu.dimension_semantics<parallel>], iteration_bounds = array<i64: 1>, scalar_prefetch = 0 : i64, scratch_operands = 0 : i64, tpu.core_type = #tpu.core_type<tc>, window_params = [{transform_indices = @transform_0, window_bounds = array<i64: 18>}, {transform_indices = @transform_1, window_bounds = array<i64: 3>}, {transform_indices = @transform_2, window_bounds = array<i64: 6, 128>}, {transform_indices = @transform_3, window_bounds = array<i64: 3, 128>}]} {
    %c0 = arith.constant 0 : index
    %c0_0 = arith.constant 0 : index
    %0 = vector.load %arg3[%c0, %c0_0] : memref<6x128xf32, #tpu.memory_space<vmem>>, vector<6x128xf32>
    %1 = vector.extract_strided_slice %0 {offsets = [0, 0], sizes = [1, 128], strides = [1, 1]} : vector<6x128xf32> to vector<1x128xf32>
    %c0_1 = arith.constant 0 : index
    %2 = memref.load %arg1[%c0_1] : memref<18xf32, #tpu.memory_space<smem>>
    %3 = vector.broadcast %2 : f32 to vector<1x128xf32>
    %4 = arith.mulf %1, %3 : vector<1x128xf32>
    %5 = vector.extract_strided_slice %0 {offsets = [1, 0], sizes = [1, 128], strides = [1, 1]} : vector<6x128xf32> to vector<1x128xf32>
    %c1 = arith.constant 1 : index
    %6 = memref.load %arg1[%c1] : memref<18xf32, #tpu.memory_space<smem>>
    %7 = vector.broadcast %6 : f32 to vector<1x128xf32>
    %8 = arith.mulf %5, %7 : vector<1x128xf32>
    %9 = arith.addf %4, %8 : vector<1x128xf32>
    %10 = vector.extract_strided_slice %0 {offsets = [2, 0], sizes = [1, 128], strides = [1, 1]} : vector<6x128xf32> to vector<1x128xf32>
    %c2 = arith.constant 2 : index
    %11 = memref.load %arg1[%c2] : memref<18xf32, #tpu.memory_space<smem>>
    %12 = vector.broadcast %11 : f32 to vector<1x128xf32>
    %13 = arith.mulf %10, %12 : vector<1x128xf32>
    %14 = arith.addf %9, %13 : vector<1x128xf32>
    %15 = vector.extract_strided_slice %0 {offsets = [3, 0], sizes = [1, 128], strides = [1, 1]} : vector<6x128xf32> to vector<1x128xf32>
    %c3 = arith.constant 3 : index
    %16 = memref.load %arg1[%c3] : memref<18xf32, #tpu.memory_space<smem>>
    %17 = vector.broadcast %16 : f32 to vector<1x128xf32>
    %18 = arith.mulf %15, %17 : vector<1x128xf32>
    %19 = arith.addf %14, %18 : vector<1x128xf32>
    %20 = vector.extract_strided_slice %0 {offsets = [4, 0], sizes = [1, 128], strides = [1, 1]} : vector<6x128xf32> to vector<1x128xf32>
    %c4 = arith.constant 4 : index
    %21 = memref.load %arg1[%c4] : memref<18xf32, #tpu.memory_space<smem>>
    %22 = vector.broadcast %21 : f32 to vector<1x128xf32>
    %23 = arith.mulf %20, %22 : vector<1x128xf32>
    %24 = arith.addf %19, %23 : vector<1x128xf32>
    %25 = vector.extract_strided_slice %0 {offsets = [5, 0], sizes = [1, 128], strides = [1, 1]} : vector<6x128xf32> to vector<1x128xf32>
    %c5 = arith.constant 5 : index
    %26 = memref.load %arg1[%c5] : memref<18xf32, #tpu.memory_space<smem>>
    %27 = vector.broadcast %26 : f32 to vector<1x128xf32>
    %28 = arith.mulf %25, %27 : vector<1x128xf32>
    %29 = arith.addf %24, %28 : vector<1x128xf32>
    %c0_2 = arith.constant 0 : index
    %30 = memref.load %arg2[%c0_2] : memref<3xf32, #tpu.memory_space<smem>>
    %31 = vector.broadcast %30 : f32 to vector<1x128xf32>
    %32 = arith.addf %29, %31 : vector<1x128xf32>
    %33 = vector.extract_strided_slice %0 {offsets = [0, 0], sizes = [1, 128], strides = [1, 1]} : vector<6x128xf32> to vector<1x128xf32>
    %c6 = arith.constant 6 : index
    %34 = memref.load %arg1[%c6] : memref<18xf32, #tpu.memory_space<smem>>
    %35 = vector.broadcast %34 : f32 to vector<1x128xf32>
    %36 = arith.mulf %33, %35 : vector<1x128xf32>
    %37 = vector.extract_strided_slice %0 {offsets = [1, 0], sizes = [1, 128], strides = [1, 1]} : vector<6x128xf32> to vector<1x128xf32>
    %c7 = arith.constant 7 : index
    %38 = memref.load %arg1[%c7] : memref<18xf32, #tpu.memory_space<smem>>
    %39 = vector.broadcast %38 : f32 to vector<1x128xf32>
    %40 = arith.mulf %37, %39 : vector<1x128xf32>
    %41 = arith.addf %36, %40 : vector<1x128xf32>
    %42 = vector.extract_strided_slice %0 {offsets = [2, 0], sizes = [1, 128], strides = [1, 1]} : vector<6x128xf32> to vector<1x128xf32>
    %c8 = arith.constant 8 : index
    %43 = memref.load %arg1[%c8] : memref<18xf32, #tpu.memory_space<smem>>
    %44 = vector.broadcast %43 : f32 to vector<1x128xf32>
    %45 = arith.mulf %42, %44 : vector<1x128xf32>
    %46 = arith.addf %41, %45 : vector<1x128xf32>
    %47 = vector.extract_strided_slice %0 {offsets = [3, 0], sizes = [1, 128], strides = [1, 1]} : vector<6x128xf32> to vector<1x128xf32>
    %c9 = arith.constant 9 : index
    %48 = memref.load %arg1[%c9] : memref<18xf32, #tpu.memory_space<smem>>
    %49 = vector.broadcast %48 : f32 to vector<1x128xf32>
    %50 = arith.mulf %47, %49 : vector<1x128xf32>
    %51 = arith.addf %46, %50 : vector<1x128xf32>
    %52 = vector.extract_strided_slice %0 {offsets = [4, 0], sizes = [1, 128], strides = [1, 1]} : vector<6x128xf32> to vector<1x128xf32>
    %c10 = arith.constant 10 : index
    %53 = memref.load %arg1[%c10] : memref<18xf32, #tpu.memory_space<smem>>
    %54 = vector.broadcast %53 : f32 to vector<1x128xf32>
    %55 = arith.mulf %52, %54 : vector<1x128xf32>
    %56 = arith.addf %51, %55 : vector<1x128xf32>
    %57 = vector.extract_strided_slice %0 {offsets = [5, 0], sizes = [1, 128], strides = [1, 1]} : vector<6x128xf32> to vector<1x128xf32>
    %c11 = arith.constant 11 : index
    %58 = memref.load %arg1[%c11] : memref<18xf32, #tpu.memory_space<smem>>
    %59 = vector.broadcast %58 : f32 to vector<1x128xf32>
    %60 = arith.mulf %57, %59 : vector<1x128xf32>
    %61 = arith.addf %56, %60 : vector<1x128xf32>
    %c1_3 = arith.constant 1 : index
    %62 = memref.load %arg2[%c1_3] : memref<3xf32, #tpu.memory_space<smem>>
    %63 = vector.broadcast %62 : f32 to vector<1x128xf32>
    %64 = arith.addf %61, %63 : vector<1x128xf32>
    %65 = vector.extract_strided_slice %0 {offsets = [0, 0], sizes = [1, 128], strides = [1, 1]} : vector<6x128xf32> to vector<1x128xf32>
    %c12 = arith.constant 12 : index
    %66 = memref.load %arg1[%c12] : memref<18xf32, #tpu.memory_space<smem>>
    %67 = vector.broadcast %66 : f32 to vector<1x128xf32>
    %68 = arith.mulf %65, %67 : vector<1x128xf32>
    %69 = vector.extract_strided_slice %0 {offsets = [1, 0], sizes = [1, 128], strides = [1, 1]} : vector<6x128xf32> to vector<1x128xf32>
    %c13 = arith.constant 13 : index
    %70 = memref.load %arg1[%c13] : memref<18xf32, #tpu.memory_space<smem>>
    %71 = vector.broadcast %70 : f32 to vector<1x128xf32>
    %72 = arith.mulf %69, %71 : vector<1x128xf32>
    %73 = arith.addf %68, %72 : vector<1x128xf32>
    %74 = vector.extract_strided_slice %0 {offsets = [2, 0], sizes = [1, 128], strides = [1, 1]} : vector<6x128xf32> to vector<1x128xf32>
    %c14 = arith.constant 14 : index
    %75 = memref.load %arg1[%c14] : memref<18xf32, #tpu.memory_space<smem>>
    %76 = vector.broadcast %75 : f32 to vector<1x128xf32>
    %77 = arith.mulf %74, %76 : vector<1x128xf32>
    %78 = arith.addf %73, %77 : vector<1x128xf32>
    %79 = vector.extract_strided_slice %0 {offsets = [3, 0], sizes = [1, 128], strides = [1, 1]} : vector<6x128xf32> to vector<1x128xf32>
    %c15 = arith.constant 15 : index
    %80 = memref.load %arg1[%c15] : memref<18xf32, #tpu.memory_space<smem>>
    %81 = vector.broadcast %80 : f32 to vector<1x128xf32>
    %82 = arith.mulf %79, %81 : vector<1x128xf32>
    %83 = arith.addf %78, %82 : vector<1x128xf32>
    %84 = vector.extract_strided_slice %0 {offsets = [4, 0], sizes = [1, 128], strides = [1, 1]} : vector<6x128xf32> to vector<1x128xf32>
    %c16 = arith.constant 16 : index
    %85 = memref.load %arg1[%c16] : memref<18xf32, #tpu.memory_space<smem>>
    %86 = vector.broadcast %85 : f32 to vector<1x128xf32>
    %87 = arith.mulf %84, %86 : vector<1x128xf32>
    %88 = arith.addf %83, %87 : vector<1x128xf32>
    %89 = vector.extract_strided_slice %0 {offsets = [5, 0], sizes = [1, 128], strides = [1, 1]} : vector<6x128xf32> to vector<1x128xf32>
    %c17 = arith.constant 17 : index
    %90 = memref.load %arg1[%c17] : memref<18xf32, #tpu.memory_space<smem>>
    %91 = vector.broadcast %90 : f32 to vector<1x128xf32>
    %92 = arith.mulf %89, %91 : vector<1x128xf32>
    %93 = arith.addf %88, %92 : vector<1x128xf32>
    %c2_4 = arith.constant 2 : index
    %94 = memref.load %arg2[%c2_4] : memref<3xf32, #tpu.memory_space<smem>>
    %95 = vector.broadcast %94 : f32 to vector<1x128xf32>
    %96 = arith.addf %93, %95 : vector<1x128xf32>
    %97 = tpu.concatenate %32, %64, %96 in 0 : vector<1x128xf32>, vector<1x128xf32>, vector<1x128xf32> -> vector<3x128xf32>
    %c0_5 = arith.constant 0 : index
    %c0_6 = arith.constant 0 : index
    %98 = vector.load %arg4[%c0_5, %c0_6] : memref<3x128xf32, #tpu.memory_space<vmem>>, vector<3x128xf32>
    tpu.vector_store %arg4[%c0_5, %c0_6], %97 {strides = array<i32>} : memref<3x128xf32, #tpu.memory_space<vmem>>, vector<3x128xf32>,
    return
  }
  func.func @transform_0(%arg0: i32) -> i32 {
    %c0_i32 = arith.constant 0 : i32
    %c0_i32_0 = arith.constant 0 : i32
    return %c0_i32 : i32
  }
  func.func @transform_1(%arg0: i32) -> i32 {
    %c0_i32 = arith.constant 0 : i32
    %c0_i32_0 = arith.constant 0 : i32
    return %c0_i32 : i32
  }
  func.func @transform_2(%arg0: i32) -> (i32, i32) {
    %c0_i32 = arith.constant 0 : i32
    %c0_i32_0 = arith.constant 0 : i32
    return %c0_i32, %arg0 : i32, i32
  }
  func.func @transform_3(%arg0: i32) -> (i32, i32) {
    %c0_i32 = arith.constant 0 : i32
    %c0_i32_0 = arith.constant 0 : i32
    return %c0_i32, %arg0 : i32, i32
  }
}

</mosaic_0001>

<bundles_post_ra>
// kernel: imunet_forward.1
= control target key start
LH: loop header
LB: loop body
LE: loop exit
PB: predicated region body
PF: predicated region fallthrough
CT: control target
= control target key end

     0   :  { %8 = vsyncpa [#allocation3], 0  ;;  %s292_s0 = inlined_call_operand.vmem [shape: f32[18], index: 0, kind: input, shape index: {}]   ;;  %s293_s1 = inlined_call_operand.vmem [shape: f32[3], index: 1, kind: input, shape index: {}]   ;;  %s294_s2 = inlined_call_operand.vmem [shape: f32[6,128], index: 2, kind: input, shape index: {}]   ;;  %s295_s3 = inlined_call_operand.vmem [shape: f32[3,128], index: 3, kind: output, shape index: {}]  }
   0x1   :  { %s15_s14 = sshll.u32 %s292_s0, 4  ;;  %s16_s14 = int_to_ptr.vmem [resolvable:$true] %s15_s14 }
   0x2   :  { %9 = vsyncpa [#allocation5], 0  ;;  %s24_s17 = sshll.u32 %s293_s1, 4  ;;  %s229_s18 = smov [#allocation2]   ;;  %s25_s17 = int_to_ptr.vmem [resolvable:$true] %s24_s17 }
   0x3   :  { %18 = dma.vmem_to_smem %s16_s14, 16, %s229_s18, [#allocation3]  }
   0x4   :  { %s230_s19 = smov [#allocation4]  }
   0x5   :  { %27 = dma.vmem_to_smem %s25_s17, 16, %s230_s19, [#allocation5]  }
   0x6   :  { %225 = dma.done.wait [#allocation3], 16  }
   0x7   :  { %226 = vsyncadd [#allocation3], 4294967280 }
   0x8   :  { %227 = dma.done.wait [#allocation5], 16  }
   0x9   :  { %228 = vsyncadd [#allocation5], 4294967280 }
   0xa   :  { %38 = sfence }
   0xb   :  { %s40_s20 = sld [smem:[#allocation2]]  ;;  %v262_v1 = vld [vmem:[%s294_s2] sm:$0x3f]  ;;  %vm169_vm0 = vcmask 1040384   ;;  %vm171_vm1 = vcmask 1041408  }
   0xc   :  { %s180_s21 = sld [smem:[#allocation2 + $0x1]] }
   0xd   :  { %s181_s22 = sld [smem:[#allocation2 + $0x2]] }
   0xe   :  { %s182_s0 = sld [smem:[#allocation2 + $0x3]] }
   0xf   :  { %s183_s23 = sld [smem:[#allocation2 + $0x4]] }
  0x10   :  { %s257_s24 = sld [smem:[#allocation2 + $0x5]] }
  0x11   :  { %v41_v0 = vstv %s40_s20  ;;  %s185_s26 = sld [smem:[#allocation2 + $0x6]] }
  0x12   :  { %v44_v2 = vstv %s180_s21  ;;  %v42_v3 = vmul.f32 %v41_v0, %v262_v1  ;;  %s186_s27 = sld [smem:[#allocation2 + $0x7]] }
  0x13   :  { %v45_v4 = vmul.f32 %v44_v2, %v262_v1  ;;  %v51_v5 = vstv %s181_s22  ;;  %s187_s28 = sld [smem:[#allocation2 + $0x8]] }
  0x14   :  { %v52_v6 = vmul.f32 %v51_v5, %v262_v1  ;;  %v58_v7 = vstv %s182_s0  ;;  %s188_s29 = sld [smem:[#allocation2 + $0x9]] }
  0x15   :  { %v47_v8 = vrot.slane %v45_v4, 1  ;;  %v65_v9 = vstv %s183_s23  ;;  %s189_s30 = sld [smem:[#allocation2 + $0xa]]  ;;  %v59_v12 = vmul.f32 %v58_v7, %v262_v1 }
  0x16   :  { %v54_v11 = vrot.slane %v52_v6, 2  ;;  %s190_s2 = sld [smem:[#allocation2 + $0xb]]  ;;  %v66_v14 = vmul.f32 %v65_v9, %v262_v1  ;;  %v72_v16 = vstv %s257_s24 }
  0x17   :  { %v49_v10 = vadd.f32 %v47_v8, %v42_v3  ;;  %v82_v13 = vstv %s185_s26  ;;  %s268_s4 = sld [smem:[#allocation4 + $0x1]]  ;;  %v61_v21 = vrot.slane %v59_v12, 3  ;;  %v73_v27 = vmul.f32 %v72_v16, %v262_v1 }
  0x18   :  { %v85_v15 = vstv %s186_s27  ;;  %s271_s5 = sld [smem:[#allocation2 + $0xc]]  ;;  %v83_v17 = vmul.f32 %v82_v13, %v262_v1  ;;  %v68_v35 = vrot.slane %v66_v14, 4 }
  0x19   :  { %v86_v18 = vmul.f32 %v85_v15, %v262_v1  ;;  %v92_v19 = vstv %s187_s28  ;;  %s193_s6 = sld [smem:[#allocation2 + $0xd]]  ;;  %v56_v20 = vadd.f32 %v54_v11, %v49_v10  ;;  %v75_v40 = vrot.slane %v73_v27, 5 }
  0x1a   :  { %v93_v22 = vmul.f32 %v92_v19, %v262_v1  ;;  %v99_v23 = vstv %s188_s29  ;;  %s194_s7 = sld [smem:[#allocation2 + $0xe]] }
  0x1b   :  { %v88_v24 = vrot.slane %v86_v18, 1  ;;  %v100_v25 = vmul.f32 %v99_v23, %v262_v1  ;;  %v106_v26 = vstv %s189_s30  ;;  %s195_s8 = sld [smem:[#allocation2 + $0xf]]  ;;  %v63_v34 = vadd.f32 %v61_v21, %v56_v20 }
  0x1c   :  { %v95_v28 = vrot.slane %v93_v22, 2  ;;  %v107_v29 = vmul.f32 %v106_v26, %v262_v1  ;;  %v113_v30 = vstv %s190_s2  ;;  %s196_s9 = sld [smem:[#allocation2 + $0x10]] }
  0x1d   :  { %v90_v31 = vadd.f32 %v88_v24, %v83_v17  ;;  %v102_v32 = vrot.slane %v100_v25, 3  ;;  %v114_v33 = vmul.f32 %v113_v30, %v262_v1  ;;  %s197_s10 = sld [smem:[#allocation2 + $0x11]]  ;;  %v70_v48 = vadd.f32 %v68_v35, %v63_v34 }
  0x1e   :  { %v123_v36 = vstv %s271_s5  ;;  %v109_v38 = vrot.slane %v107_v29, 4  ;;  %s78_s11 = sld [smem:[#allocation4]]  ;;  %v120_v56 = vstv %s268_s4 }
  0x1f   :  { %v97_v37 = vadd.f32 %v95_v28, %v90_v31  ;;  %v126_v39 = vstv %s193_s6  ;;  %v124_v41 = vmul.f32 %v123_v36, %v262_v1  ;;  %v116_v45 = vrot.slane %v114_v33, 5  ;;  %s198_s12 = sld [smem:[#allocation4 + $0x2]] }
  0x20   :  { %v127_v42 = vmul.f32 %v126_v39, %v262_v1  ;;  %v133_v43 = vstv %s194_s7  ;;  %v77_v63 = vadd.f32 %v75_v40, %v70_v48 }
  0x21   :  { %v104_v44 = vadd.f32 %v102_v32, %v97_v37  ;;  %v134_v46 = vmul.f32 %v133_v43, %v262_v1  ;;  %v140_v47 = vstv %s195_s8 }
  0x22   :  { %v129_v49 = vrot.slane %v127_v42, 1  ;;  %v141_v50 = vmul.f32 %v140_v47, %v262_v1  ;;  %v147_v51 = vstv %s196_s9 }
  0x23   :  { %v111_v52 = vadd.f32 %v109_v38, %v104_v44  ;;  %v136_v53 = vrot.slane %v134_v46, 2  ;;  %v148_v54 = vmul.f32 %v147_v51, %v262_v1  ;;  %v154_v55 = vstv %s197_s10 }
  0x24   :  { %v131_v57 = vadd.f32 %v129_v49, %v124_v41  ;;  %v143_v58 = vrot.slane %v141_v50, 3  ;;  %v155_v59 = vmul.f32 %v154_v55, %v262_v1  ;;  %v79_v2 = vstv %s78_s11 }
  0x25   :  { %v118_v60 = vadd.f32 %v116_v45, %v111_v52  ;;  %v150_v62 = vrot.slane %v148_v54, 4  ;;  %v80_v6 = vadd.f32 %v79_v2, %v77_v63  ;;  %v161_v7 = vstv %s198_s12 }
  0x26   :  { %v138_v61 = vadd.f32 %v136_v53, %v131_v57  ;;  %v157_v4 = vrot.slane %v155_v59, 5 }
  0x27   :  { %v121_v0 = vadd.f32 %v120_v56, %v118_v60 }
  0x28   :  { %v145_v3 = vadd.f32 %v143_v58, %v138_v61 }
  0x29   :  { %v164_v8 = vrot.slane %v121_v0, 7 }
  0x2a   :  { %v152_v5 = vadd.f32 %v150_v62, %v145_v3 }
  0x2b   :  { %v170_v11 = vsel %vm169_vm0, %v80_v6, %v164_v8 }
  0x2c   :  { %v159_v9 = vadd.f32 %v157_v4, %v152_v5 }
  0x2e   :  { %v162_v10 = vadd.f32 %v161_v7, %v159_v9 }
  0x30   :  { %v167_v12 = vrot.slane %v162_v10, 6 }
  0x32   :  { %v172_v13 = vsel %vm171_vm1, %v170_v11, %v167_v12 }
  0x33   :  { %173 = vst [vmem:[%s295_s3] sm:$0x7] %v172_v13 }
  0x34   :  { %178 = vsyncpa [#allocation3], 1 }
  0x35   :  { %179 = vsyncpa [#allocation5], 1 }

</bundles_post_ra>
